<compile_context>
chip_gen: v5e
topology: v5e:2x2
jax: 0.10.0
libtpu: 0.0.40
codegen_flags: <defaults>
</compile_context>

<pallas_src>
import jax
import jax.numpy as jnp
from jax.experimental import pallas as pl
from jax.experimental.pallas import tpu as pltpu

# Logical layer widths: 64 -> 128 -> 128 -> 64 -> 64
LAYER_DIMS = [(64, 128), (128, 128), (128, 64), (64, 64)]
IN_FEATURES = 64
OUT_FEATURES = 64
FOLD = 2  # logical rows packed per lane-dense (128-wide) row


def _ceil_div(a, b):
    return -(-a // b)


def _round_up(a, m):
    return _ceil_div(a, m) * m


def othello_mlp_kernel(x_ref,
                       w1_ref, b1_ref,
                       w2_ref, b2_ref,
                       w3_ref, b3_ref,
                       w4_ref, b4_ref,
                       o_ref):
    """One folded batch tile through the whole 4-layer MLP.

    x_ref:  (tb2, 128) f32   -- two logical 64-wide rows per folded row
    w*_ref: block-diagonal folded weights (bf16), b*_ref folded biases (f32)
    o_ref:  (tb2, 128) out_dtype
    """
    cdt = w1_ref.dtype  # MXU compute dtype (bf16)

    # Cast to compute dtype in-kernel (VPU) instead of a wrapper HBM pass.
    x = x_ref[...].astype(cdt)                                      # (tb2, 128)

    # fc1 + ReLU (f32 accumulation; bias/ReLU on the f32 accumulator)
    h = jnp.dot(x, w1_ref[...], preferred_element_type=jnp.float32)  # (tb2, 256)
    h = jnp.maximum(h + b1_ref[...], 0.0)
    # fc2 + ReLU
    h = jnp.dot(h.astype(cdt), w2_ref[...], preferred_element_type=jnp.float32)
    h = jnp.maximum(h + b2_ref[...], 0.0)                            # (tb2, 256)
    # fc3 + ReLU
    h = jnp.dot(h.astype(cdt), w3_ref[...], preferred_element_type=jnp.float32)
    h = jnp.maximum(h + b3_ref[...], 0.0)                            # (tb2, 128)
    # fc4 (no activation)
    h = jnp.dot(h.astype(cdt), w4_ref[...], preferred_element_type=jnp.float32)
    o_ref[...] = (h + b4_ref[...]).astype(o_ref.dtype)               # (tb2, 128)


def othello_net_forward(x, params, *, tile_b=2048,
                        compute_dtype=jnp.bfloat16,
                        out_dtype=jnp.float32,
                        vmem_limit_bytes=None):
    """x: [B, 64] float32; params: weights [in,out], biases [1,out].

    Returns [B, 64] in `out_dtype`.  The batch is folded two-rows-per-lane-row
    and tiled over a 1-D parallel grid.
    """
    B, f_in = x.shape
    assert f_in == IN_FEATURES
    assert tile_b % 32 == 0, "tile_b must be a multiple of 32"

    # ---- fold two logical rows into one lane-dense 128-wide row ------------
    b_eff = B
    if B % FOLD:
        # Rare odd-batch case: pad a single row so the fold is exact.
        x = jnp.pad(x, ((0, FOLD - B % FOLD), (0, 0)))
        b_eff = x.shape[0]
    n_fold = b_eff // FOLD
    x_fold = x.reshape(n_fold, FOLD * IN_FEATURES)   # free row-major reshape

    # ---- tile sizing --------------------------------------------------------
    tb2 = tile_b // FOLD                              # folded rows per tile
    if n_fold >= 16:
        # Keep >= 2 tiles when the batch allows it so
        # dimension_semantics=("parallel",) can shard across v7x's 2 TCs.
        tb2 = min(tb2, _round_up(_ceil_div(n_fold, 2), 8))
    # Never exceed the array (a full-extent block is always legal); the ragged
    # last tile of a multi-tile grid is handled by Pallas block clipping.
    tb2 = min(tb2, n_fold)
    num_tiles = _ceil_div(n_fold, tb2)

    # ---- folded (block-diagonal) weights / biases ---------------------------
    def fold_w(w):
        z = jnp.zeros_like(w)
        top = jnp.concatenate([w, z], axis=1)
        bot = jnp.concatenate([z, w], axis=1)
        return jnp.concatenate([top, bot], axis=0).astype(compute_dtype)

    def fold_b(b):
        return jnp.concatenate([b, b], axis=1).astype(jnp.float32)

    ws = [fold_w(params[f"w{i}"]) for i in range(1, 5)]
    bs = [fold_b(params[f"b{i}"]) for i in range(1, 5)]

    # ---- BlockSpecs ---------------------------------------------------------
    x_spec = pl.BlockSpec((tb2, FOLD * IN_FEATURES), lambda i: (i, 0))
    out_spec = pl.BlockSpec((tb2, FOLD * OUT_FEATURES), lambda i: (i, 0))

    def resident_spec(a):
        # Full array, same block every grid step -> DMA'd once, stays in VMEM.
        return pl.BlockSpec(a.shape, lambda i: (0, 0))

    in_specs = [x_spec]
    args = [x_fold]
    for w, b in zip(ws, bs):
        in_specs += [resident_spec(w), resident_spec(b)]
        args += [w, b]

    # ---- advisory cost estimate ---------------------------------------------
    rows = num_tiles * tb2
    flops = 2 * rows * sum(w.shape[0] * w.shape[1] for w in ws)
    bytes_accessed = (
        n_fold * FOLD * IN_FEATURES * x_fold.dtype.itemsize
        + n_fold * FOLD * OUT_FEATURES * jnp.dtype(out_dtype).itemsize
        + sum(int(w.size) * w.dtype.itemsize for w in ws)
        + sum(int(b.size) * b.dtype.itemsize for b in bs))
    cost = pl.CostEstimate(flops=int(flops), transcendentals=0,
                           bytes_accessed=int(bytes_accessed))

    out_fold = pl.pallas_call(
        othello_mlp_kernel,
        out_shape=jax.ShapeDtypeStruct((n_fold, FOLD * OUT_FEATURES), out_dtype),
        grid=(num_tiles,),
        in_specs=in_specs,
        out_specs=out_spec,
        compiler_params=pltpu.CompilerParams(
            dimension_semantics=("parallel",),
            # Default scoped VMEM (16 MiB on v5e, 32 MiB on v6e/v7x) is ample
            # at the default tile; bump this when sweeping tile_b upward.
            vmem_limit_bytes=vmem_limit_bytes),
        cost_estimate=cost,
    )(*args)

    out = out_fold.reshape(b_eff, OUT_FEATURES)   # free unfold
    return out[:B]


def init_params(key):
    """Deterministic synthetic init matching nn.Linear shapes (stored transposed)."""
    params = {}
    for i, (fan_in, fan_out) in enumerate(LAYER_DIMS, start=1):
        key, kw, kb = jax.random.split(key, 3)
        bound = 1.0 / jnp.sqrt(fan_in)  # same scale as PyTorch's default init
        params[f"w{i}"] = jax.random.uniform(
            kw, (fan_in, fan_out), jnp.float32, minval=-bound, maxval=bound)
        params[f"b{i}"] = jax.random.uniform(
            kb, (1, fan_out), jnp.float32, minval=-bound, maxval=bound)
    return params


def reference_forward(x, params, compute_dtype=jnp.bfloat16):
    """Pure-JAX reference using the same mixed precision as the kernel.

    Note: this (and the kernel) uses bf16 inputs to the MXU with f32
    accumulation, so it will not bit-match a pure-f32 PyTorch OthelloNet.
    """
    h = x.astype(compute_dtype)
    for i in range(1, 5):
        w = params[f"w{i}"].astype(compute_dtype)
        b = params[f"b{i}"].astype(jnp.float32)
        h32 = jnp.dot(h, w, preferred_element_type=jnp.float32) + b
        if i < 4:
            h32 = jnp.maximum(h32, 0.0)
            h = h32.astype(compute_dtype)
        else:
            return h32


if __name__ == "__main__":
    key = jax.random.PRNGKey(0)
    key, kx1, kx2 = jax.random.split(key, 3)
    params = init_params(key)

    # Case 1: tiny batch (8 flattened 8x8 boards) -> single full-extent folded
    # tile of 4 lane-dense rows.
    B1 = 8
    x1 = jax.random.normal(kx1, (B1, 64), jnp.float32)
    out1 = jax.block_until_ready(othello_net_forward(x1, params))
    ref1 = reference_forward(x1, params)
    assert out1.shape == (B1, 64) and out1.dtype == jnp.float32
    assert jnp.allclose(out1, ref1, atol=1e-2, rtol=1e-2), "mismatch (case 1)"

    # Case 2: batch that does not divide the tile -> 2-step parallel grid with
    # a ragged (clipped) last tile and no wrapper-side padding of x.
    B2 = 200
    x2 = jax.random.normal(kx2, (B2, 64), jnp.float32)
    out2 = jax.block_until_ready(othello_net_forward(x2, params, tile_b=128))
    ref2 = reference_forward(x2, params)
    assert out2.shape == (B2, 64)
    assert jnp.allclose(out2, ref2, atol=1e-2, rtol=1e-2), "mismatch (case 2)"

    print("KERNEL_OK")
</pallas_src>

<mosaic_0001>
module attributes {stable_mosaic.version = 11 : i64} {
  func.func @othello_mlp_kernel(%arg0: i32, %arg1: memref<4x128xf32, #tpu.memory_space<vmem>>, %arg2: memref<128x256xbf16, #tpu.memory_space<vmem>>, %arg3: memref<1x256xf32, #tpu.memory_space<vmem>>, %arg4: memref<256x256xbf16, #tpu.memory_space<vmem>>, %arg5: memref<1x256xf32, #tpu.memory_space<vmem>>, %arg6: memref<256x128xbf16, #tpu.memory_space<vmem>>, %arg7: memref<1x128xf32, #tpu.memory_space<vmem>>, %arg8: memref<128x128xbf16, #tpu.memory_space<vmem>>, %arg9: memref<1x128xf32, #tpu.memory_space<vmem>>, %arg10: memref<4x128xf32, #tpu.memory_space<vmem>>) attributes {dimension_semantics = [#tpu.dimension_semantics<parallel>], iteration_bounds = array<i64: 1>, scalar_prefetch = 0 : i64, scratch_operands = 0 : i64, tpu.core_type = #tpu.core_type<tc>, window_params = [{transform_indices = @transform_0, window_bounds = array<i64: 4, 128>}, {pipeline_mode = #tpu.pipeline_mode<synchronous>, transform_indices = @transform_1, window_bounds = array<i64: 128, 256>}, {pipeline_mode = #tpu.pipeline_mode<synchronous>, transform_indices = @transform_2, window_bounds = array<i64: 1, 256>}, {pipeline_mode = #tpu.pipeline_mode<synchronous>, transform_indices = @transform_3, window_bounds = array<i64: 256, 256>}, {pipeline_mode = #tpu.pipeline_mode<synchronous>, transform_indices = @transform_4, window_bounds = array<i64: 1, 256>}, {pipeline_mode = #tpu.pipeline_mode<synchronous>, transform_indices = @transform_5, window_bounds = array<i64: 256, 128>}, {pipeline_mode = #tpu.pipeline_mode<synchronous>, transform_indices = @transform_6, window_bounds = array<i64: 1, 128>}, {pipeline_mode = #tpu.pipeline_mode<synchronous>, transform_indices = @transform_7, window_bounds = array<i64: 128, 128>}, {pipeline_mode = #tpu.pipeline_mode<synchronous>, transform_indices = @transform_8, window_bounds = array<i64: 1, 128>}, {transform_indices = @transform_9, window_bounds = array<i64: 4, 128>}]} {
    %c0 = arith.constant 0 : index
    %c0_0 = arith.constant 0 : index
    %0 = vector.load %arg1[%c0, %c0_0] : memref<4x128xf32, #tpu.memory_space<vmem>>, vector<4x128xf32>
    %1 = arith.truncf %0 : vector<4x128xf32> to vector<4x128xbf16>
    %c0_1 = arith.constant 0 : index
    %c0_2 = arith.constant 0 : index
    %2 = vector.load %arg2[%c0_1, %c0_2] : memref<128x256xbf16, #tpu.memory_space<vmem>>, vector<128x256xbf16>
    %cst = arith.constant dense<0.000000e+00> : vector<4x256xf32>
    %3 = tpu.matmul %1, %2, %cst {dimension_numbers = #tpu.dot_dimension_numbers<[1], [0], [0], [1], [0, 0, 1, 1], [], []>} : vector<4x128xbf16>, vector<128x256xbf16>, vector<4x256xf32> -> vector<4x256xf32>
    %c0_3 = arith.constant 0 : index
    %c0_4 = arith.constant 0 : index
    %4 = vector.load %arg3[%c0_3, %c0_4] : memref<1x256xf32, #tpu.memory_space<vmem>>, vector<1x256xf32>
    %5 = vector.broadcast %4 : vector<1x256xf32> to vector<4x256xf32>
    %6 = arith.addf %3, %5 : vector<4x256xf32>
    %cst_5 = arith.constant 0.000000e+00 : f32
    %7 = vector.broadcast %cst_5 : f32 to vector<4x256xf32>
    %8 = arith.maximumf %6, %7 : vector<4x256xf32>
    %9 = arith.truncf %8 : vector<4x256xf32> to vector<4x256xbf16>
    %c0_6 = arith.constant 0 : index
    %c0_7 = arith.constant 0 : index
    %10 = vector.load %arg4[%c0_6, %c0_7] : memref<256x256xbf16, #tpu.memory_space<vmem>>, vector<256x256xbf16>
    %cst_8 = arith.constant dense<0.000000e+00> : vector<4x256xf32>
    %11 = tpu.matmul %9, %10, %cst_8 {dimension_numbers = #tpu.dot_dimension_numbers<[1], [0], [0], [1], [0, 0, 1, 1], [], []>} : vector<4x256xbf16>, vector<256x256xbf16>, vector<4x256xf32> -> vector<4x256xf32>
    %c0_9 = arith.constant 0 : index
    %c0_10 = arith.constant 0 : index
    %12 = vector.load %arg5[%c0_9, %c0_10] : memref<1x256xf32, #tpu.memory_space<vmem>>, vector<1x256xf32>
    %13 = vector.broadcast %12 : vector<1x256xf32> to vector<4x256xf32>
    %14 = arith.addf %11, %13 : vector<4x256xf32>
    %cst_11 = arith.constant 0.000000e+00 : f32
    %15 = vector.broadcast %cst_11 : f32 to vector<4x256xf32>
    %16 = arith.maximumf %14, %15 : vector<4x256xf32>
    %17 = arith.truncf %16 : vector<4x256xf32> to vector<4x256xbf16>
    %c0_12 = arith.constant 0 : index
    %c0_13 = arith.constant 0 : index
    %18 = vector.load %arg6[%c0_12, %c0_13] : memref<256x128xbf16, #tpu.memory_space<vmem>>, vector<256x128xbf16>
    %cst_14 = arith.constant dense<0.000000e+00> : vector<4x128xf32>
    %19 = tpu.matmul %17, %18, %cst_14 {dimension_numbers = #tpu.dot_dimension_numbers<[1], [0], [0], [1], [0, 0, 1, 1], [], []>} : vector<4x256xbf16>, vector<256x128xbf16>, vector<4x128xf32> -> vector<4x128xf32>
    %c0_15 = arith.constant 0 : index
    %c0_16 = arith.constant 0 : index
    %20 = vector.load %arg7[%c0_15, %c0_16] : memref<1x128xf32, #tpu.memory_space<vmem>>, vector<1x128xf32>
    %21 = vector.broadcast %20 : vector<1x128xf32> to vector<4x128xf32>
    %22 = arith.addf %19, %21 : vector<4x128xf32>
    %cst_17 = arith.constant 0.000000e+00 : f32
    %23 = vector.broadcast %cst_17 : f32 to vector<4x128xf32>
    %24 = arith.maximumf %22, %23 : vector<4x128xf32>
    %25 = arith.truncf %24 : vector<4x128xf32> to vector<4x128xbf16>
    %c0_18 = arith.constant 0 : index
    %c0_19 = arith.constant 0 : index
    %26 = vector.load %arg8[%c0_18, %c0_19] : memref<128x128xbf16, #tpu.memory_space<vmem>>, vector<128x128xbf16>
    %cst_20 = arith.constant dense<0.000000e+00> : vector<4x128xf32>
    %27 = tpu.matmul %25, %26, %cst_20 {dimension_numbers = #tpu.dot_dimension_numbers<[1], [0], [0], [1], [0, 0, 1, 1], [], []>} : vector<4x128xbf16>, vector<128x128xbf16>, vector<4x128xf32> -> vector<4x128xf32>
    %c0_21 = arith.constant 0 : index
    %c0_22 = arith.constant 0 : index
    %28 = vector.load %arg9[%c0_21, %c0_22] : memref<1x128xf32, #tpu.memory_space<vmem>>, vector<1x128xf32>
    %29 = vector.broadcast %28 : vector<1x128xf32> to vector<4x128xf32>
    %30 = arith.addf %27, %29 : vector<4x128xf32>
    %c0_23 = arith.constant 0 : index
    %c0_24 = arith.constant 0 : index
    %31 = vector.load %arg10[%c0_23, %c0_24] : memref<4x128xf32, #tpu.memory_space<vmem>>, vector<4x128xf32>
    tpu.vector_store %arg10[%c0_23, %c0_24], %30 {strides = array<i32>} : memref<4x128xf32, #tpu.memory_space<vmem>>, vector<4x128xf32>,
    return
  }
  func.func @transform_0(%arg0: i32) -> (i32, i32) {
    %c0_i32 = arith.constant 0 : i32
    %c0_i32_0 = arith.constant 0 : i32
    return %arg0, %c0_i32 : i32, i32
  }
  func.func @transform_1(%arg0: i32) -> (i32, i32) {
    %c0_i32 = arith.constant 0 : i32
    %c0_i32_0 = arith.constant 0 : i32
    %c0_i32_1 = arith.constant 0 : i32
    return %c0_i32, %c0_i32_0 : i32, i32
  }
  func.func @transform_2(%arg0: i32) -> (i32, i32) {
    %c0_i32 = arith.constant 0 : i32
    %c0_i32_0 = arith.constant 0 : i32
    %c0_i32_1 = arith.constant 0 : i32
    return %c0_i32, %c0_i32_0 : i32, i32
  }
  func.func @transform_3(%arg0: i32) -> (i32, i32) {
    %c0_i32 = arith.constant 0 : i32
    %c0_i32_0 = arith.constant 0 : i32
    %c0_i32_1 = arith.constant 0 : i32
    return %c0_i32, %c0_i32_0 : i32, i32
  }
  func.func @transform_4(%arg0: i32) -> (i32, i32) {
    %c0_i32 = arith.constant 0 : i32
    %c0_i32_0 = arith.constant 0 : i32
    %c0_i32_1 = arith.constant 0 : i32
    return %c0_i32, %c0_i32_0 : i32, i32
  }
  func.func @transform_5(%arg0: i32) -> (i32, i32) {
    %c0_i32 = arith.constant 0 : i32
    %c0_i32_0 = arith.constant 0 : i32
    %c0_i32_1 = arith.constant 0 : i32
    return %c0_i32, %c0_i32_0 : i32, i32
  }
  func.func @transform_6(%arg0: i32) -> (i32, i32) {
    %c0_i32 = arith.constant 0 : i32
    %c0_i32_0 = arith.constant 0 : i32
    %c0_i32_1 = arith.constant 0 : i32
    return %c0_i32, %c0_i32_0 : i32, i32
  }
  func.func @transform_7(%arg0: i32) -> (i32, i32) {
    %c0_i32 = arith.constant 0 : i32
    %c0_i32_0 = arith.constant 0 : i32
    %c0_i32_1 = arith.constant 0 : i32
    return %c0_i32, %c0_i32_0 : i32, i32
  }
  func.func @transform_8(%arg0: i32) -> (i32, i32) {
    %c0_i32 = arith.constant 0 : i32
    %c0_i32_0 = arith.constant 0 : i32
    %c0_i32_1 = arith.constant 0 : i32
    return %c0_i32, %c0_i32_0 : i32, i32
  }
  func.func @transform_9(%arg0: i32) -> (i32, i32) {
    %c0_i32 = arith.constant 0 : i32
    %c0_i32_0 = arith.constant 0 : i32
    return %arg0, %c0_i32 : i32, i32
  }
}

</mosaic_0001>

<bundles_post_ra>
// kernel: tpu_custom_call.1
= control target key start
LH: loop header
LB: loop body
LE: loop exit
PB: predicated region body
PF: predicated region fallthrough
CT: control target
= control target key end

     0   :  { %14 = vsyncpa [#allocation3], 0  ;;  %s1415_s0 = inlined_call_operand.hbm [shape: f32[4,128], index: 0, kind: input, shape index: {}]   ;;  %s1416_s1 = inlined_call_operand.hbm [shape: bf16[128,256], index: 1, kind: input, shape index: {}]   ;;  %s1417_s2 = inlined_call_operand.hbm [shape: f32[1,256], index: 2, kind: input, shape index: {}]   ;;  %s1418_s3 = inlined_call_operand.hbm [shape: bf16[256,256], index: 3, kind: input, shape index: {}]   ;;  %s1419_s4 = inlined_call_operand.vmem [shape: f32[1,256], index: 4, kind: input, shape index: {}]   ;;  %s1420_s5 = inlined_call_operand.hbm [shape: bf16[256,128], index: 5, kind: input, shape index: {}]   ;;  %s1421_s6 = inlined_call_operand.vmem [shape: f32[1,128], index: 6, kind: input, shape index: {}]   ;;  %s1422_s7 = inlined_call_operand.hbm [shape: bf16[128,128], index: 7, kind: input, shape index: {}]   ;;  %s1423_s8 = inlined_call_operand.vmem [shape: f32[1,128], index: 8, kind: input, shape index: {}]   ;;  %s1424_s9 = inlined_call_operand.hbm [shape: f32[4,128], index: 9, kind: output, shape index: {}]  }
   0x1   :  { %15 = vsyncpa [#allocation6], 0 }
   0x2   :  { %16 = vsyncpa [#allocation9], 0 }
   0x3   :  { %17 = vsyncpa [#allocation12], 0  ;;  %s34_s11 = sshll.u32 %s1416_s1, 4  ;;  %s35_s11 = int_to_ptr.hbm [resolvable:$true] %s34_s11 }
   0x4   :  { %18 = vsyncpa [#allocation4], 0  ;;  %s1324_s12 = smov [#allocation5]   ;;  %s58_s16 = sshll.u32 %s1418_s3, 4  ;;  %s59_s16 = int_to_ptr.hbm [resolvable:$true] %s58_s16 }
   0x5   :  { %s36_s13 = sshll.u32 %s1324_s12, 4  ;;  %s1325_s17 = smov 128   ;;  %s37_s13 = int_to_ptr.vmem [resolvable:$true] %s36_s13 }
   0x6   :  { %s1326_s18 = smov 8   ;;  %s1327_s19 = smov [#allocation8]  }
   0x7   :  { %42 = dma.hbm_to_vmem [thread:$0]  %s35_s11, 2048, %s37_s13, [#allocation6], %s1325_s17, %s1325_s17, %s1326_s18  }
   0x8   :  { %s60_s20 = sshll.u32 %s1327_s19, 4  ;;  %s24_s23 = sshll.u32 %s1415_s0, 4  ;;  %s61_s20 = int_to_ptr.vmem [resolvable:$true] %s60_s20  ;;  %s25_s23 = int_to_ptr.hbm [resolvable:$true] %s24_s23 }
   0x9   :  { %66 = dma.hbm_to_vmem [thread:$0]  %s59_s16, 4096, %s61_s20, [#allocation9], %s1325_s17, %s1325_s17, %s1326_s18  }
   0xa   :  { %s48_s25 = sshll.u32 %s1417_s2, 4  ;;  %s1328_s26 = smov [#allocation2]   ;;  %s49_s25 = int_to_ptr.hbm [resolvable:$true] %s48_s25 }
   0xb   :  { %s26_s27 = sshll.u32 %s1328_s26, 4  ;;  %s1329_s3 = smov [#allocation7]   ;;  %s27_s27 = int_to_ptr.vmem [resolvable:$true] %s26_s27 }
   0xc   :  { %29 = dma.hbm_to_vmem [thread:$0]  %s25_s23, 64, %s27_s27, [#allocation3]  }
   0xd   :  { %s50_s28 = sshll.u32 %s1329_s3, 4  ;;  %s73_s10 = sshll.u32 %s1420_s5, 4  ;;  %s51_s28 = int_to_ptr.vmem [resolvable:$true] %s50_s28  ;;  %s74_s10 = int_to_ptr.hbm [resolvable:$true] %s73_s10 }
   0xe   :  { %53 = dma.hbm_to_vmem [thread:$0]  %s49_s25, 32, %s51_s28, [#allocation6]  }
   0xf   :  { %s1330_s0 = smov [#allocation10]   ;;  %s88_s2 = sshll.u32 %s1422_s7, 4  ;;  %s89_s2 = int_to_ptr.hbm [resolvable:$true] %s88_s2 }
  0x10   :  { %s75_s11 = sshll.u32 %s1330_s0, 4  ;;  %s1331_s14 = smov 64   ;;  %s76_s11 = int_to_ptr.vmem [resolvable:$true] %s75_s11 }
  0x11   :  { %s1332_s15 = smov 4   ;;  %s1333_s16 = smov [#allocation11]  }
  0x12   :  { %81 = dma.hbm_to_vmem [thread:$0]  %s74_s10, 2048, %s76_s11, [#allocation9], %s1331_s14, %s1331_s14, %s1332_s15  }
  0x13   :  { %s90_s17 = sshll.u32 %s1333_s16, 4  ;;  %s91_s17 = int_to_ptr.vmem [resolvable:$true] %s90_s17 }
  0x14   :  { %96 = dma.hbm_to_vmem [thread:$0]  %s89_s2, 1024, %s91_s17, [#allocation12], %s1331_s14, %s1331_s14, %s1332_s15  }
  0x15   :  { %1314 = dma.done.wait [#allocation3], 64  }
  0x16   :  { %1315 = vsyncadd [#allocation3], 4294967232 }
  0x17   :  { %1316 = dma.done.wait [#allocation6], 2080  }
  0x18   :  { %1317 = vsyncadd [#allocation6], 4294965216 }
  0x19   :  { %1318 = dma.done.wait [#allocation9], 6144  }
  0x1a   :  { %1319 = vsyncadd [#allocation9], 4294961152 }
  0x1b   :  { %1320 = dma.done.wait [#allocation12], 1024  }
  0x1c   :  { %1321 = vsyncadd [#allocation12], 4294966272  ;;  %v831_v0 = vld [vmem:[#allocation5 + $0x70] sm:$0xf]  ;;  %v1076_v1 = vld [vmem:[#allocation5 + $0x74] sm:$0xf0] }
  0x1d   :  { %v1075_v2 = vld [vmem:[#allocation5 + $0x74] sm:$0xf]  ;;  %v832_v3 = vor.u32 %v1076_v1, %v831_v0  ;;  %v833_v4 = vld [vmem:[#allocation5 + $0x78] sm:$0xf0]  ;;  %v823_v5 = vld [vmem:[#allocation5 + $0x60] sm:$0xf] }
  0x1e   :  { %v1074_v6 = vld [vmem:[#allocation5 + $0x64] sm:$0xf0]  ;;  %v836_v7 = vor.u32 %v1075_v2, %v833_v4  ;;  %v1073_v8 = vld [vmem:[#allocation5 + $0x64] sm:$0xf]  ;;  %v825_v9 = vld [vmem:[#allocation5 + $0x68] sm:$0xf0] }
  0x1f   :  { %227 = vmatpush.bf16.msra.mxu0 %v832_v3  ;;  %v824_v10 = vor.u32 %v1074_v6, %v823_v5  ;;  %v828_v11 = vor.u32 %v1073_v8, %v825_v9  ;;  %v815_v12 = vld [vmem:[#allocation5 + $0x50] sm:$0xf]  ;;  %v1072_v13 = vld [vmem:[#allocation5 + $0x54] sm:$0xf0]  ;;  %v1071_v14 = vld [vmem:[#allocation5 + $0x54] sm:$0xf] }
  0x20   :  { %240 = vmatpush.bf16.msra.mxu1 %v836_v7  ;;  %v817_v15 = vld [vmem:[#allocation5 + $0x58] sm:$0xf0]  ;;  %v816_v16 = vor.u32 %v1072_v13, %v815_v12  ;;  %v807_v18 = vld [vmem:[#allocation5 + $0x40] sm:$0xf]  ;;  %v1070_v19 = vld [vmem:[#allocation5 + $0x44] sm:$0xf0] }
  0x21   :  { %v820_v17 = vor.u32 %v1071_v14, %v817_v15  ;;  %v1069_v20 = vld [vmem:[#allocation5 + $0x44] sm:$0xf]  ;;  %v809_v21 = vld [vmem:[#allocation5 + $0x48] sm:$0xf0]  ;;  %v808_v22 = vor.u32 %v1070_v19, %v807_v18  ;;  %v895_v23 = vld [vmem:[#allocation8 + $0x70] sm:$0xf] }
  0x22   :  { %v1092_v24 = vld [vmem:[#allocation8 + $0x74] sm:$0xf0]  ;;  %v959_v25 = vld [vmem:[#allocation8 + $0xf0] sm:$0xf]  ;;  %v812_v26 = vor.u32 %v1069_v20, %v809_v21  ;;  %v887_v34 = vld [vmem:[#allocation8 + $0x60] sm:$0xf] }
  0x23   :  { %228 = vmatpush.bf16.msra.mxu0 %v824_v10  ;;  %v799_v27 = vld [vmem:[#allocation5 + $0x30] sm:$0xf]  ;;  %v1068_v28 = vld [vmem:[#allocation5 + $0x34] sm:$0xf0]  ;;  %v896_v29 = vor.u32 %v1092_v24, %v895_v23  ;;  %v1067_v31 = vld [vmem:[#allocation5 + $0x34] sm:$0xf] }
  0x24   :  { %241 = vmatpush.bf16.msra.mxu1 %v828_v11  ;;  %v1108_v30 = vld [vmem:[#allocation8 + $0xf4] sm:$0xf0]  ;;  %v1090_v35 = vld [vmem:[#allocation8 + $0x64] sm:$0xf0]  ;;  %v951_v36 = vld [vmem:[#allocation8 + $0xe0] sm:$0xf]  ;;  %v800_v38 = vor.u32 %v1068_v28, %v799_v27 }
  0x25   :  { %v801_v32 = vld [vmem:[#allocation5 + $0x38] sm:$0xf0]  ;;  %v960_v33 = vor.u32 %v1108_v30, %v959_v25  ;;  %455 = vmatpush.bf16.msra.mxu2 %v896_v29  ;;  %v1106_v37 = vld [vmem:[#allocation8 + $0xe4] sm:$0xf0]  ;;  %v791_v39 = vld [vmem:[#allocation5 + $0x20] sm:$0xf]  ;;  %v888_v41 = vor.u32 %v1090_v35, %v887_v34 }
  0x26   :  { %v1066_v40 = vld [vmem:[#allocation5 + $0x24] sm:$0xf0]  ;;  %v952_v42 = vor.u32 %v1106_v37, %v951_v36  ;;  %v804_v43 = vor.u32 %v1067_v31, %v801_v32  ;;  %v1065_v44 = vld [vmem:[#allocation5 + $0x24] sm:$0xf]  ;;  %v879_v45 = vld [vmem:[#allocation8 + $0x50] sm:$0xf] }
  0x27   :  { %229 = vmatpush.bf16.msra.mxu0 %v816_v16  ;;  %468 = vmatpush.bf16.msra.mxu3 %v960_v33  ;;  %v1088_v46 = vld [vmem:[#allocation8 + $0x54] sm:$0xf0]  ;;  %v793_v47 = vld [vmem:[#allocation5 + $0x28] sm:$0xf0]  ;;  %v943_v48 = vld [vmem:[#allocation8 + $0xd0] sm:$0xf]  ;;  %v792_v51 = vor.u32 %v1066_v40, %v791_v39 }
  0x28   :  { %242 = vmatpush.bf16.msra.mxu1 %v820_v17  ;;  %v1104_v49 = vld [vmem:[#allocation8 + $0xd4] sm:$0xf0]  ;;  %v880_v50 = vor.u32 %v1088_v46, %v879_v45  ;;  %v783_v52 = vld [vmem:[#allocation5 + $0x10] sm:$0xf]  ;;  %v871_v54 = vld [vmem:[#allocation8 + $0x40] sm:$0xf]  ;;  %v796_v56 = vor.u32 %v1065_v44, %v793_v47 }
  0x29   :  { %456 = vmatpush.bf16.msra.mxu2 %v888_v41  ;;  %v944_v53 = vor.u32 %v1104_v49, %v943_v48  ;;  %v1086_v55 = vld [vmem:[#allocation8 + $0x44] sm:$0xf0]  ;;  %v1064_v57 = vld [vmem:[#allocation5 + $0x14] sm:$0xf0]  ;;  %v935_v58 = vld [vmem:[#allocation8 + $0xc0] sm:$0xf] }
  0x2a   :  { %v1102_v59 = vld [vmem:[#allocation8 + $0xc4] sm:$0xf0]  ;;  %v1063_v60 = vld [vmem:[#allocation5 + $0x14] sm:$0xf]  ;;  %v785_v61 = vld [vmem:[#allocation5 + $0x18] sm:$0xf0]  ;;  %v872_v0 = vor.u32 %v1086_v55, %v871_v54  ;;  %v784_v1 = vor.u32 %v1064_v57, %v783_v52 }
  0x2b   :  { %230 = vmatpush.bf16.msra.mxu0 %v808_v22  ;;  %469 = vmatpush.bf16.msra.mxu3 %v952_v42  ;;  %v775_v62 = vld [vmem:[#allocation5] sm:$0xf]  ;;  %v1062_v63 = vld [vmem:[#allocation5 + $0x4] sm:$0xf0]  ;;  %v1061_v2 = vld [vmem:[#allocation5 + $0x4] sm:$0xf]  ;;  %v936_v3 = vor.u32 %v1102_v59, %v935_v58  ;;  %v788_v6 = vor.u32 %v1063_v60, %v785_v61 }
  0x2c   :  { %243 = vmatpush.bf16.msra.mxu1 %v812_v26  ;;  %v863_v4 = vld [vmem:[#allocation8 + $0x30] sm:$0xf]  ;;  %v1084_v5 = vld [vmem:[#allocation8 + $0x34] sm:$0xf0]  ;;  %v777_v7 = vld [vmem:[#allocation5 + $0x8] sm:$0xf0]  ;;  %v776_v17 = vor.u32 %v1062_v63, %v775_v62 }
  0x2d   :  { %457 = vmatpush.bf16.msra.mxu2 %v880_v50  ;;  %v927_v8 = vld [vmem:[#allocation8 + $0xb0] sm:$0xf]  ;;  %v1100_v9 = vld [vmem:[#allocation8 + $0xb4] sm:$0xf0]  ;;  %v1091_v11 = vld [vmem:[#allocation8 + $0x74] sm:$0xf]  ;;  %v864_v15 = vor.u32 %v1084_v5, %v863_v4  ;;  %v780_v20 = vor.u32 %v1061_v2, %v777_v7 }
  0x2e   :  { %v123_v10 = vld [vmem:[#allocation2] sm:$0xf]  ;;  %v1107_v13 = vld [vmem:[#allocation8 + $0xf4] sm:$0xf]  ;;  %v855_v16 = vld [vmem:[#allocation8 + $0x20] sm:$0xf]  ;;  %v928_v18 = vor.u32 %v1100_v9, %v927_v8 }
  0x2f   :  { %231 = vmatpush.bf16.msra.mxu0 %v800_v38  ;;  %470 = vmatpush.bf16.msra.mxu3 %v944_v53  ;;  %v897_v12 = vld [vmem:[#allocation8 + $0x78] sm:$0xf0]  ;;  %v1082_v19 = vld [vmem:[#allocation8 + $0x24] sm:$0xf0]  ;;  %v919_v22 = vld [vmem:[#allocation8 + $0xa0] sm:$0xf]  ;;  %v124_v27 = vpack.c.bf16 %v123_v10, %v123_v10 }
  0x30   :  { %244 = vmatpush.bf16.msra.mxu1 %v804_v43  ;;  %v961_v14 = vld [vmem:[#allocation8 + $0xf8] sm:$0xf0]  ;;  %v900_v21 = vor.u32 %v1091_v11, %v897_v12  ;;  %v1098_v23 = vld [vmem:[#allocation8 + $0xa4] sm:$0xf0]  ;;  %v1089_v25 = vld [vmem:[#allocation8 + $0x64] sm:$0xf]  ;;  %v856_v30 = vor.u32 %v1082_v19, %v855_v16 }
  0x31   :  { %458 = vmatpush.bf16.msra.mxu2 %v872_v0  ;;  %v964_v24 = vor.u32 %v1107_v13, %v961_v14  ;;  %v889_v26 = vld [vmem:[#allocation8 + $0x68] sm:$0xf0]  ;;  %v1105_v28 = vld [vmem:[#allocation8 + $0xe4] sm:$0xf]  ;;  %v920_v31 = vor.u32 %v1098_v23, %v919_v22  ;;  %v1087_v34 = vld [vmem:[#allocation8 + $0x54] sm:$0xf] }
  0x32   :  { %v953_v29 = vld [vmem:[#allocation8 + $0xe8] sm:$0xf0]  ;;  %v892_v32 = vor.u32 %v1089_v25, %v889_v26  ;;  %v881_v35 = vld [vmem:[#allocation8 + $0x58] sm:$0xf0]  ;;  %v1103_v36 = vld [vmem:[#allocation8 + $0xd4] sm:$0xf] }
  0x33   :  { %232 = vmatpush.bf16.msra.mxu0 %v792_v51  ;;  %471 = vmatpush.bf16.msra.mxu3 %v936_v3  ;;  %v956_v33 = vor.u32 %v1105_v28, %v953_v29  ;;  %v945_v37 = vld [vmem:[#allocation8 + $0xd8] sm:$0xf0]  ;;  %v884_v38 = vor.u32 %v1087_v34, %v881_v35  ;;  %v1085_v40 = vld [vmem:[#allocation8 + $0x44] sm:$0xf]  ;;  %v873_v41 = vld [vmem:[#allocation8 + $0x48] sm:$0xf0] }
  0x34   :  { %245 = vmatpush.bf16.msra.mxu1 %v796_v56  ;;  %v948_v39 = vor.u32 %v1103_v36, %v945_v37  ;;  %v1101_v42 = vld [vmem:[#allocation8 + $0xc4] sm:$0xf]  ;;  %v937_v43 = vld [vmem:[#allocation8 + $0xc8] sm:$0xf0]  ;;  %v876_v44 = vor.u32 %v1085_v40, %v873_v41  ;;  %v1083_v46 = vld [vmem:[#allocation8 + $0x34] sm:$0xf] }
  0x35   :  { %459 = vmatpush.bf16.msra.mxu2 %v864_v15  ;;  %v940_v45 = vor.u32 %v1101_v42, %v937_v43  ;;  %v865_v47 = vld [vmem:[#allocation8 + $0x38] sm:$0xf0]  ;;  %v1099_v48 = vld [vmem:[#allocation8 + $0xb4] sm:$0xf]  ;;  %v1081_v52 = vld [vmem:[#allocation8 + $0x24] sm:$0xf] }
  0x36   :  { %v929_v49 = vld [vmem:[#allocation8 + $0xb8] sm:$0xf0]  ;;  %v868_v50 = vor.u32 %v1083_v46, %v865_v47  ;;  %v857_v53 = vld [vmem:[#allocation8 + $0x28] sm:$0xf0]  ;;  %v1097_v54 = vld [vmem:[#allocation8 + $0xa4] sm:$0xf] }
  0x37   :  { %233 = vmatpush.bf16.msra.mxu0 %v784_v1  ;;  %472 = vmatpush.bf16.msra.mxu3 %v928_v18  ;;  %v932_v51 = vor.u32 %v1099_v48, %v929_v49  ;;  %v921_v55 = vld [vmem:[#allocation8 + $0xa8] sm:$0xf0]  ;;  %v860_v56 = vor.u32 %v1081_v52, %v857_v53  ;;  %v847_v58 = vld [vmem:[#allocation8 + $0x10] sm:$0xf]  ;;  %v1080_v59 = vld [vmem:[#allocation8 + $0x14] sm:$0xf0] }
  0x38   :  { %246 = vmatpush.bf16.msra.mxu1 %v788_v6  ;;  %v924_v57 = vor.u32 %v1097_v54, %v921_v55  ;;  %v911_v60 = vld [vmem:[#allocation8 + $0x90] sm:$0xf]  ;;  %v848_v61 = vor.u32 %v1080_v59, %v847_v58  ;;  %v1096_v62 = vld [vmem:[#allocation8 + $0x94] sm:$0xf0]  ;;  %v1079_v63 = vld [vmem:[#allocation8 + $0x14] sm:$0xf] }
  0x39   :  { %460 = vmatpush.bf16.msra.mxu2 %v856_v30  ;;  %v849_v0 = vld [vmem:[#allocation8 + $0x18] sm:$0xf0]  ;;  %v912_v1 = vor.u32 %v1096_v62, %v911_v60  ;;  %v1095_v3 = vld [vmem:[#allocation8 + $0x94] sm:$0xf]  ;;  %v839_v6 = vld [vmem:[#allocation8] sm:$0xf] }
  0x3a   :  { %v852_v2 = vor.u32 %v1079_v63, %v849_v0  ;;  %v913_v4 = vld [vmem:[#allocation8 + $0x98] sm:$0xf0]  ;;  %v1078_v7 = vld [vmem:[#allocation8 + $0x4] sm:$0xf0]  ;;  %v903_v8 = vld [vmem:[#allocation8 + $0x80] sm:$0xf] }
  0x3b   :  { %234 = vmatpush.bf16.msra.mxu0 %v776_v17  ;;  %473 = vmatpush.bf16.msra.mxu3 %v920_v31  ;;  %v916_v5 = vor.u32 %v1095_v3, %v913_v4  ;;  %v840_v9 = vor.u32 %v1078_v7, %v839_v6  ;;  %v1094_v10 = vld [vmem:[#allocation8 + $0x84] sm:$0xf0]  ;;  %v1077_v11 = vld [vmem:[#allocation8 + $0x4] sm:$0xf]  ;;  %v841_v12 = vld [vmem:[#allocation8 + $0x8] sm:$0xf0] }
  0x3c   :  { %247 = vmatpush.bf16.msra.mxu1 %v780_v20  ;;  %v904_v13 = vor.u32 %v1094_v10, %v903_v8  ;;  %v844_v14 = vor.u32 %v1077_v11, %v841_v12  ;;  %v1093_v15 = vld [vmem:[#allocation8 + $0x84] sm:$0xf]  ;;  %v905_v16 = vld [vmem:[#allocation8 + $0x88] sm:$0xf0]  ;;  %v1124_v18 = vld [vmem:[#allocation10 + $0x78] sm:$0xff]  ;;  %s1334_s21 = smov [#allocation13]  }
  0x3d   :  { %461 = vmatpush.bf16.msra.mxu2 %v848_v61  ;;  %v908_v17 = vor.u32 %v1093_v15, %v905_v16  ;;  %v1116_v19 = vld [vmem:[#allocation10 + $0x38] sm:$0xff]  ;;  %v1123_v20 = vld [vmem:[#allocation10 + $0x70] sm:$0xff]  ;;  %v1122_v22 = vld [vmem:[#allocation10 + $0x68] sm:$0xff]  ;;  %s758_s22 = sshll.u32 %s1334_s21, 4  ;;  %s760_s24 = sshll.u32 %s1424_s9, 4  ;;  %s759_s22 = int_to_ptr.vmem [resolvable:$true] %s758_s22  ;;  %s761_s24 = int_to_ptr.hbm [resolvable:$true] %s760_s24 }
  0x3e   :  { %235 = vmatmul.bf16.vlgmr.msra.gmra.mxu0 %v124_v27  ;;  %v1114_v23 = vld [vmem:[#allocation10 + $0x28] sm:$0xff]  ;;  %v1113_v25 = vld [vmem:[#allocation10 + $0x20] sm:$0xff]  ;;  %v1120_v26 = vld [vmem:[#allocation10 + $0x58] sm:$0xff] }
  0x3f   :  { %481 = vmatpush.bf16.msrb.mxu0 %v900_v21  ;;  %248 = vmatmul.bf16.vlgmr.msra.gmra.mxu1 %v124_v27  ;;  %v1115_v21 = vld [vmem:[#allocation10 + $0x30] sm:$0xff]  ;;  %v141_v27 = vld [vmem:[#allocation7] sm:$0x3]  ;;  %v1118_v42 = vld [vmem:[#allocation10 + $0x48] sm:$0xff] }
  0x40   :  { %494 = vmatpush.bf16.msrb.mxu1 %v964_v24  ;;  %474 = vmatpush.bf16.msra.mxu3 %v912_v1  ;;  %v1121_v24 = vld [vmem:[#allocation10 + $0x60] sm:$0xff]  ;;  %v1119_v28 = vld [vmem:[#allocation10 + $0x50] sm:$0xff]  ;;  %v143_v29 = vperm.slane %v141_v27, 0  ;;  %v144_v30 = vperm.slane %v141_v27, 1  ;;  %v1112_v41 = vld [vmem:[#allocation10 + $0x18] sm:$0xff] }
  0x41   :  { %462 = vmatpush.bf16.msra.mxu2 %v840_v9  ;;  %v1111_v43 = vld [vmem:[#allocation10 + $0x10] sm:$0xff]  ;;  %v1109_v46 = vld [vmem:[#allocation10] sm:$0xff]  ;;  %v1132_v47 = vld [vmem:[#allocation11 + $0x38] sm:$0xff] }
  0x42   :  { %v1131_v48 = vld [vmem:[#allocation11 + $0x30] sm:$0xff]  ;;  %v1130_v49 = vld [vmem:[#allocation11 + $0x28] sm:$0xff]  ;;  %v1128_v6 = vld [vmem:[#allocation11 + $0x18] sm:$0xff] }
  0x43   :  { %482 = vmatpush.bf16.msrb.mxu0 %v892_v32  ;;  %v1127_v7 = vld [vmem:[#allocation11 + $0x10] sm:$0xff]  ;;  %v1126_v8 = vld [vmem:[#allocation11 + $0x8] sm:$0xff]  ;;  %v1125_v9 = vld [vmem:[#allocation11] sm:$0xff] }
  0x44   :  { %495 = vmatpush.bf16.msrb.mxu1 %v956_v33  ;;  %475 = vmatpush.bf16.msra.mxu3 %v904_v13  ;;  %v1144_v11 = vld [vmem:[%s1421_s6] ss:$0 sm:$0xff] }
  0x45   :  { %643 = vmatpush.bf16.msrb.mxu2 %v1116_v19  ;;  %v1145_v19 = vld [vmem:[%s1423_s8] ss:$0 sm:$0xff] }
  0x47   :  { %483 = vmatpush.bf16.msrb.mxu0 %v884_v38 }
  0x48   :  { %496 = vmatpush.bf16.msrb.mxu1 %v948_v39  ;;  %656 = vmatpush.bf16.msrb.mxu3 %v1124_v18 }
  0x49   :  { %644 = vmatpush.bf16.msrb.mxu2 %v1115_v21 }
  0x4b   :  { %484 = vmatpush.bf16.msrb.mxu0 %v876_v44  ;;  %v1117_v44 = vld [vmem:[#allocation10 + $0x40] sm:$0xff] }
  0x4c   :  { %497 = vmatpush.bf16.msrb.mxu1 %v940_v45  ;;  %657 = vmatpush.bf16.msrb.mxu3 %v1123_v20  ;;  %v1110_v45 = vld [vmem:[#allocation10 + $0x8] sm:$0xff] }
  0x4d   :  { %645 = vmatpush.bf16.msrb.mxu2 %v1114_v23 }
  0x4f   :  { %485 = vmatpush.bf16.msrb.mxu0 %v868_v50  ;;  %v1129_v50 = vld [vmem:[#allocation11 + $0x20] sm:$0xff] }
  0x50   :  { %498 = vmatpush.bf16.msrb.mxu1 %v932_v51  ;;  %658 = vmatpush.bf16.msrb.mxu3 %v1122_v22  ;;  %v289_v51 = vld [vmem:[%s1419_s4] sm:$0x3] }
  0x51   :  { %646 = vmatpush.bf16.msrb.mxu2 %v1113_v25  ;;  %v292_v52 = vperm.slane %v289_v51, 1 }
  0x53   :  { %486 = vmatpush.bf16.msrb.mxu0 %v860_v56 }
  0x54   :  { %499 = vmatpush.bf16.msrb.mxu1 %v924_v57  ;;  %659 = vmatpush.bf16.msrb.mxu3 %v1121_v24  ;;  %v291_v57 = vperm.slane %v289_v51, 0 }
  0x55   :  { %647 = vmatpush.bf16.msrb.mxu2 %v1112_v41 }
  0x57   :  { %487 = vmatpush.bf16.msrb.mxu0 %v852_v2 }
  0x58   :  { %500 = vmatpush.bf16.msrb.mxu1 %v916_v5  ;;  %660 = vmatpush.bf16.msrb.mxu3 %v1120_v26 }
  0x59   :  { %648 = vmatpush.bf16.msrb.mxu2 %v1111_v43 }
  0x5b   :  { %488 = vmatpush.bf16.msrb.mxu0 %v844_v14 }
  0x5c   :  { %501 = vmatpush.bf16.msrb.mxu1 %v908_v17  ;;  %661 = vmatpush.bf16.msrb.mxu3 %v1119_v28 }
  0x5d   :  { %649 = vmatpush.bf16.msrb.mxu2 %v1110_v45 }
  0x5f   :  { %739 = vmatpush.bf16.msra.mxu0 %v1132_v47 }
  0x60   :  { %662 = vmatpush.bf16.msrb.mxu3 %v1118_v42 }
  0x61   :  { %650 = vmatpush.bf16.msrb.mxu2 %v1109_v46 }
  0x63   :  { %740 = vmatpush.bf16.msra.mxu0 %v1131_v48 }
  0x64   :  { %663 = vmatpush.bf16.msrb.mxu3 %v1117_v44 }
  0x67   :  { %741 = vmatpush.bf16.msra.mxu0 %v1130_v49 }
  0x6b   :  { %742 = vmatpush.bf16.msra.mxu0 %v1129_v50 }
  0x6f   :  { %743 = vmatpush.bf16.msra.mxu0 %v1128_v6 }
  0x73   :  { %744 = vmatpush.bf16.msra.mxu0 %v1127_v7 }
  0x77   :  { %745 = vmatpush.bf16.msra.mxu0 %v1126_v8 }
  0x7b   :  { %746 = vmatpush.bf16.msra.mxu0 %v1125_v9 }
  0xbb   :  { %v236_v31 = vpop.f32.mrf.mxu0 }
  0xbc   :  { %v237_v32 = vadd.f32 %v236_v31, %v143_v29  ;;  %v249_v33 = vpop.f32.mrf.mxu1 }
  0xbd   :  { %v250_v34 = vadd.f32 %v249_v33, %v144_v30 }
  0xbe   :  { %v253_v35 = vmax.f32 %v237_v32, 0.0 }
  0xbf   :  { %v254_v36 = vmax.f32 %v250_v34, 0.0 }
  0xc0   :  { %v255_v37 = vpack.c.bf16 %v253_v35, %v253_v35 }
  0xc1   :  { %v256_v38 = vpack.c.bf16 %v254_v36, %v254_v36 }
  0xc2   :  { %463 = vmatmul.bf16.vlgmr.msra.gmra.mxu2 %v255_v37  ;;  %489 = vmatmul.bf16.vlgmr.msrb.gmra.mxu0 %v255_v37 }
  0xc3   :  { %476 = vmatmul.bf16.vlgmr.msra.gmra.mxu3 %v256_v38  ;;  %502 = vmatmul.bf16.vlgmr.msrb.gmra.mxu1 %v256_v38  ;;  %v238_v39 = vpop.f32.mrf.mxu0 }
  0xc4   :  { %v251_v40 = vpop.f32.mrf.mxu1 }
 0x13f   :  { %v490_v53 = vpop.f32.mrf.mxu0 }
 0x140   :  { %v491_v54 = vadd.f32 %v490_v53, %v292_v52  ;;  %v503_v55 = vpop.f32.mrf.mxu1 }
 0x142   :  { %v504_v56 = vadd.f32 %v503_v55, %v491_v54 }
 0x144   :  { %v508_v58 = vmax.f32 %v504_v56, 0.0 }
 0x145   :  { %v464_v59 = vpop.f32.mrf.mxu2 }
 0x146   :  { %v510_v60 = vpack.c.bf16 %v508_v58, %v508_v58  ;;  %v465_v61 = vadd.f32 %v464_v59, %v291_v57  ;;  %v477_v62 = vpop.f32.mrf.mxu3 }
 0x147   :  { %v492_v63 = vpop.f32.mrf.mxu0 }
 0x148   :  { %v478_v0 = vadd.f32 %v477_v62, %v465_v61  ;;  %v505_v1 = vpop.f32.mrf.mxu1  ;;  %664 = vmatmul.bf16.vlgmr.msrb.gmra.mxu3 %v510_v60 }
 0x14a   :  { %v507_v2 = vmax.f32 %v478_v0, 0.0 }
 0x14c   :  { %v509_v3 = vpack.c.bf16 %v507_v2, %v507_v2 }
 0x14d   :  { %v466_v4 = vpop.f32.mrf.mxu2 }
 0x14e   :  { %v479_v5 = vpop.f32.mrf.mxu3  ;;  %651 = vmatmul.bf16.vlgmr.msrb.gmra.mxu2 %v509_v3 }
 0x1cb   :  { %v665_v10 = vpop.f32.mrf.mxu3 }
 0x1d1   :  { %v652_v12 = vpop.f32.mrf.mxu2 }
 0x1d2   :  { %v653_v13 = vadd.f32 %v1144_v11, %v652_v12 }
 0x1d3   :  { %v667_v14 = vpop.f32.mrf.mxu3 }
 0x1d4   :  { %v666_v15 = vadd.f32 %v665_v10, %v653_v13 }
 0x1d6   :  { %v669_v16 = vmax.f32 %v666_v15, 0.0 }
 0x1d8   :  { %v670_v17 = vpack.c.bf16 %v669_v16, %v669_v16 }
 0x1d9   :  { %v654_v18 = vpop.f32.mrf.mxu2 }
 0x1da   :  { %747 = vmatmul.bf16.vlgmr.msra.gmra.mxu0 %v670_v17 }
 0x257   :  { %v748_v20 = vpop.f32.mrf.mxu0 }
 0x258   :  { %v749_v21 = vadd.f32 %v1145_v19, %v748_v20 }
 0x25a   :  { %752 = vst [vmem:[#allocation13] sm:$0xf] %v749_v21 }
 0x25b   :  { %763 = dma.vmem_to_hbm [thread:$0]  %s759_s22, 64, %s761_s24, [#allocation4]  }
 0x25f   :  { %v750_v22 = vpop.f32.mrf.mxu0 }
 0x260   :  { %1322 = dma.done.wait [#allocation4], 64  }
 0x261   :  { %1323 = vsyncadd [#allocation4], 4294967232 }
 0x262   :  { %768 = vsyncpa [#allocation3], 1 }
 0x263   :  { %769 = vsyncpa [#allocation6], 1 }
 0x264   :  { %770 = vsyncpa [#allocation9], 1 }
 0x265   :  { %771 = vsyncpa [#allocation12], 1 }
 0x266   :  { %772 = vsyncpa [#allocation4], 1 }

</bundles_post_ra>
